<compile_context>
chip_gen: v6e
topology: v6e:2x2x1
jax: 0.10.0
libtpu: 0.0.40
codegen_flags: <defaults>
</compile_context>

<pallas_src>
import functools

import jax
import jax.numpy as jnp
from jax.experimental import pallas as pl
from jax.experimental.pallas import tpu as pltpu


def fcn_head_kernel(x_ref, w3t_ref, shift_ref, w1t_ref, b1_ref, o_ref, xpad_ref,
                    *, H, W):
    """Fused 3x3 conv (BN scale folded) + BN shift + ReLU + 1x1 conv (+bias).

    x_ref     : (1, Cin, H*W)         one batch element; channels on sublanes,
                                      flattened spatial on lanes (lane-dense)
    w3t_ref   : (Cmid, 9*Cin)         3x3 weight * BN scale, tap-major columns
    shift_ref : (Cmid, 1)             folded BN shift (acts as the conv bias)
    w1t_ref   : (Cout, Cmid)          1x1 conv weight (transposed)
    b1_ref    : (Cout, 1)             1x1 conv bias
    o_ref     : (1, Cout, H*W)        output, native NCHW (flattened spatial)
    xpad_ref  : (Cin, HALO+H*W+HALO)  VMEM scratch with zero halos covering the
                                      vertical taps (lane-aligned interior)
    """
    Cin = x_ref.shape[1]
    HW = H * W
    Cout = o_ref.shape[1]
    HALO = (xpad_ref.shape[1] - HW) // 2

    x2 = x_ref[0]                                       # (Cin, HW)

    # Zero the halos (scratch is uninitialized on each core's first step) and
    # drop the activation in with a lane-aligned store: halo handled in-kernel,
    # no wrapper-side jnp.pad HBM pass.
    zeros_halo = jnp.zeros((Cin, HALO), dtype=x2.dtype)
    xpad_ref[:, 0:HALO] = zeros_halo
    xpad_ref[:, HALO + HW:2 * HALO + HW] = zeros_halo
    xpad_ref[:, HALO:HALO + HW] = x2

    # Column-validity masks for the horizontal taps (vertical taps read the
    # zero halo, so they need no mask).
    lane = jax.lax.broadcasted_iota(jnp.int32, (Cin, HW), 1)
    if (W & (W - 1)) == 0:
        col = jnp.bitwise_and(lane, W - 1)
    else:
        col = lane % W
    left_ok = col >= 1           # source column x-1 is in bounds
    right_ok = col <= W - 2      # source column x+1 is in bounds

    # im2col: nine shifted (Cin, HW) views -> one (9*Cin, HW) patch slab.
    pieces = []
    for oy in (-1, 0, 1):
        for ox in (-1, 0, 1):
            start = HALO + oy * W + ox
            piece = xpad_ref[:, start:start + HW]
            if ox == -1:
                piece = jnp.where(left_ok, piece, 0.0)
            elif ox == 1:
                piece = jnp.where(right_ok, piece, 0.0)
            pieces.append(piece)
    patches = jnp.concatenate(pieces, axis=0)           # (9*Cin, HW)

    # 3x3 conv (+ folded BN scale): ONE MXU matmul, K = 9*Cin, N = HW.
    acc = jnp.dot(w3t_ref[...], patches, preferred_element_type=jnp.float32)

    # Folded BN shift + ReLU.
    y = jnp.maximum(acc + shift_ref[...], 0.0)          # (Cmid, HW)

    # Dropout2d(0.1) is the identity at inference time.
    # TODO(synk): training-mode channel dropout (Dropout2d) not implemented.

    # 1x1 conv (+bias): MXU matmul with lane-dense N = HW; unmasked stores.
    out = jnp.dot(w1t_ref[...], y, preferred_element_type=jnp.float32) + b1_ref[...]
    o_ref[...] = out.reshape(1, Cout, HW).astype(o_ref.dtype)


def fcn_head_forward(x_nchw, params, eps=1e-5):
    """x_nchw: (N, Cin, H, W) float32.  Returns (N, Cout, H, W)."""
    w3 = params["w3"]          # (3, 3, Cin, Cmid)  HWIO
    gamma, beta = params["gamma"], params["beta"]
    mean, var = params["mean"], params["var"]
    w1, b1 = params["w1"], params["b1"]

    N, Cin, H, W = x_nchw.shape
    Cmid = w3.shape[3]
    Cout = w1.shape[1]
    HW = H * W

    # Fold BN into the conv: scale into the weights, shift becomes the bias.
    scale = gamma / jnp.sqrt(var + eps)
    shift = beta - mean * scale
    w3t = jnp.transpose((w3 * scale[None, None, None, :]).reshape(9 * Cin, Cmid),
                        (1, 0))                          # (Cmid, 9*Cin), tap-major
    w1t = jnp.transpose(w1, (1, 0))                      # (Cout, Cmid)

    # NCHW with flattened spatial is a free view; no transpose / pad HBM pass.
    x_flat = x_nchw.reshape(N, Cin, HW)

    # Halo large enough for a +/-(W+1) lane shift, rounded to a lane tile so the
    # interior scratch store stays aligned.
    halo = ((W + 1 + 127) // 128) * 128

    kernel = functools.partial(fcn_head_kernel, H=H, W=W)
    out_flat = pl.pallas_call(
        kernel,
        out_shape=jax.ShapeDtypeStruct((N, Cout, HW), x_nchw.dtype),
        grid=(N,),
        in_specs=[
            pl.BlockSpec((1, Cin, HW), lambda n: (n, 0, 0)),
            pl.BlockSpec((Cmid, 9 * Cin), lambda n: (0, 0)),
            pl.BlockSpec((Cmid, 1), lambda n: (0, 0)),
            pl.BlockSpec((Cout, Cmid), lambda n: (0, 0)),
            pl.BlockSpec((Cout, 1), lambda n: (0, 0)),
        ],
        out_specs=pl.BlockSpec((1, Cout, HW), lambda n: (n, 0, 0)),
        scratch_shapes=[pltpu.VMEM((Cin, 2 * halo + HW), x_nchw.dtype)],
        compiler_params=pltpu.CompilerParams(dimension_semantics=("parallel",)),
    )(x_flat, w3t, shift.reshape(Cmid, 1), w1t, b1.reshape(Cout, 1))

    return out_flat.reshape(N, Cout, H, W)


def reference_forward(x_nchw, params, eps=1e-5):
    """Pure-JAX reference of the same math (for correctness check)."""
    x = jnp.transpose(x_nchw, (0, 2, 3, 1))
    y = jax.lax.conv_general_dilated(
        x, params["w3"], window_strides=(1, 1), padding=((1, 1), (1, 1)),
        dimension_numbers=("NHWC", "HWIO", "NHWC"),
    )
    scale = params["gamma"] / jnp.sqrt(params["var"] + eps)
    shift = params["beta"] - params["mean"] * scale
    y = y * scale + shift
    y = jnp.maximum(y, 0.0)
    y = jnp.einsum("nhwc,co->nhwo", y, params["w1"]) + params["b1"]
    return jnp.transpose(y, (0, 3, 1, 2))


if __name__ == "__main__":
    # Module config: in_planes=16 -> inter_planes=4, out_planes=8 (num classes).
    N, Cin, H, W = 2, 16, 16, 16
    Cmid = Cin // 4
    Cout = 8

    key = jax.random.PRNGKey(0)
    kx, kw3, kw1, kb1, kg, kb, km, kv = jax.random.split(key, 8)

    x = jax.random.normal(kx, (N, Cin, H, W), dtype=jnp.float32)
    params = {
        "w3": jax.random.normal(kw3, (3, 3, Cin, Cmid), dtype=jnp.float32) * 0.1,
        "gamma": 1.0 + 0.1 * jax.random.normal(kg, (Cmid,), dtype=jnp.float32),
        "beta": 0.1 * jax.random.normal(kb, (Cmid,), dtype=jnp.float32),
        "mean": 0.1 * jax.random.normal(km, (Cmid,), dtype=jnp.float32),
        "var": jnp.abs(jax.random.normal(kv, (Cmid,), dtype=jnp.float32)) + 0.5,
        "w1": jax.random.normal(kw1, (Cmid, Cout), dtype=jnp.float32) * 0.1,
        "b1": 0.1 * jax.random.normal(kb1, (Cout,), dtype=jnp.float32),
    }

    out = jax.block_until_ready(fcn_head_forward(x, params))
    ref = jax.block_until_ready(reference_forward(x, params))

    assert out.shape == (N, Cout, H, W), out.shape
    assert jnp.allclose(out, ref, atol=1e-4, rtol=1e-4), float(jnp.abs(out - ref).max())
    print("KERNEL_OK")
</pallas_src>

<mosaic_0001>
module attributes {stable_mosaic.version = 11 : i64} {
  func.func @fcn_head_kernel(%arg0: i32, %arg1: memref<1x16x256xf32, #tpu.memory_space<vmem>>, %arg2: memref<4x144xf32, #tpu.memory_space<vmem>>, %arg3: memref<4x1xf32, #tpu.memory_space<vmem>>, %arg4: memref<8x4xf32, #tpu.memory_space<vmem>>, %arg5: memref<8x1xf32, #tpu.memory_space<vmem>>, %arg6: memref<1x8x256xf32, #tpu.memory_space<vmem>>, %arg7: memref<16x512xf32, #tpu.memory_space<vmem>>) attributes {dimension_semantics = [#tpu.dimension_semantics<parallel>], iteration_bounds = array<i64: 2>, scalar_prefetch = 0 : i64, scratch_operands = 1 : i64, tpu.core_type = #tpu.core_type<tc>, window_params = [{transform_indices = @transform_0, window_bounds = array<i64: 1, 16, 256>}, {pipeline_mode = #tpu.pipeline_mode<synchronous>, transform_indices = @transform_1, window_bounds = array<i64: 4, 144>}, {pipeline_mode = #tpu.pipeline_mode<synchronous>, transform_indices = @transform_2, window_bounds = array<i64: 4, 1>}, {pipeline_mode = #tpu.pipeline_mode<synchronous>, transform_indices = @transform_3, window_bounds = array<i64: 8, 4>}, {pipeline_mode = #tpu.pipeline_mode<synchronous>, transform_indices = @transform_4, window_bounds = array<i64: 8, 1>}, {transform_indices = @transform_5, window_bounds = array<i64: 1, 8, 256>}]} {
    %c0 = arith.constant 0 : index
    %c0_0 = arith.constant 0 : index
    %c0_1 = arith.constant 0 : index
    %0 = vector.load %arg1[%c0, %c0_0, %c0_1] : memref<1x16x256xf32, #tpu.memory_space<vmem>>, vector<1x16x256xf32>
    %1 = vector.shape_cast %0 : vector<1x16x256xf32> to vector<16x256xf32>
    %cst = arith.constant 0.000000e+00 : f32
    %2 = vector.broadcast %cst : f32 to vector<16x128xf32>
    %c0_2 = arith.constant 0 : index
    %c0_3 = arith.constant 0 : index
    %3 = vector.load %arg7[%c0_2, %c0_3] : memref<16x512xf32, #tpu.memory_space<vmem>>, vector<16x128xf32>
    tpu.vector_store %arg7[%c0_2, %c0_3], %2 {strides = array<i32>} : memref<16x512xf32, #tpu.memory_space<vmem>>, vector<16x128xf32>,
    %c0_4 = arith.constant 0 : index
    %c384 = arith.constant 384 : index
    %4 = vector.load %arg7[%c0_4, %c384] : memref<16x512xf32, #tpu.memory_space<vmem>>, vector<16x128xf32>
    tpu.vector_store %arg7[%c0_4, %c384], %2 {strides = array<i32>} : memref<16x512xf32, #tpu.memory_space<vmem>>, vector<16x128xf32>,
    %c0_5 = arith.constant 0 : index
    %c128 = arith.constant 128 : index
    %5 = vector.load %arg7[%c0_5, %c128] : memref<16x512xf32, #tpu.memory_space<vmem>>, vector<16x256xf32>
    tpu.vector_store %arg7[%c0_5, %c128], %1 {strides = array<i32>} : memref<16x512xf32, #tpu.memory_space<vmem>>, vector<16x256xf32>,
    %6 = tpu.iota {dimensions = array<i32: 1>} : vector<16x256xi32>
    %c15_i32 = arith.constant 15 : i32
    %7 = vector.broadcast %c15_i32 : i32 to vector<16x256xi32>
    %8 = arith.andi %6, %7 : vector<16x256xi32>
    %c1_i32 = arith.constant 1 : i32
    %9 = vector.broadcast %c1_i32 : i32 to vector<16x256xi32>
    %10 = arith.cmpi sge, %8, %9 : vector<16x256xi32>
    %c14_i32 = arith.constant 14 : i32
    %11 = vector.broadcast %c14_i32 : i32 to vector<16x256xi32>
    %12 = arith.cmpi sle, %8, %11 : vector<16x256xi32>
    %c0_6 = arith.constant 0 : index
    %c111 = arith.constant 111 : index
    %13 = vector.load %arg7[%c0_6, %c111] : memref<16x512xf32, #tpu.memory_space<vmem>>, vector<16x256xf32>
    %cst_7 = arith.constant 0.000000e+00 : f32
    %14 = vector.broadcast %cst_7 : f32 to vector<16x256xf32>
    %15 = arith.select %10, %13, %14 : vector<16x256xi1>, vector<16x256xf32>
    %c0_8 = arith.constant 0 : index
    %c112 = arith.constant 112 : index
    %16 = vector.load %arg7[%c0_8, %c112] : memref<16x512xf32, #tpu.memory_space<vmem>>, vector<16x256xf32>
    %c0_9 = arith.constant 0 : index
    %c113 = arith.constant 113 : index
    %17 = vector.load %arg7[%c0_9, %c113] : memref<16x512xf32, #tpu.memory_space<vmem>>, vector<16x256xf32>
    %cst_10 = arith.constant 0.000000e+00 : f32
    %18 = vector.broadcast %cst_10 : f32 to vector<16x256xf32>
    %19 = arith.select %12, %17, %18 : vector<16x256xi1>, vector<16x256xf32>
    %c0_11 = arith.constant 0 : index
    %c127 = arith.constant 127 : index
    %20 = vector.load %arg7[%c0_11, %c127] : memref<16x512xf32, #tpu.memory_space<vmem>>, vector<16x256xf32>
    %cst_12 = arith.constant 0.000000e+00 : f32
    %21 = vector.broadcast %cst_12 : f32 to vector<16x256xf32>
    %22 = arith.select %10, %20, %21 : vector<16x256xi1>, vector<16x256xf32>
    %c0_13 = arith.constant 0 : index
    %c128_14 = arith.constant 128 : index
    %23 = vector.load %arg7[%c0_13, %c128_14] : memref<16x512xf32, #tpu.memory_space<vmem>>, vector<16x256xf32>
    %c0_15 = arith.constant 0 : index
    %c129 = arith.constant 129 : index
    %24 = vector.load %arg7[%c0_15, %c129] : memref<16x512xf32, #tpu.memory_space<vmem>>, vector<16x256xf32>
    %cst_16 = arith.constant 0.000000e+00 : f32
    %25 = vector.broadcast %cst_16 : f32 to vector<16x256xf32>
    %26 = arith.select %12, %24, %25 : vector<16x256xi1>, vector<16x256xf32>
    %c0_17 = arith.constant 0 : index
    %c143 = arith.constant 143 : index
    %27 = vector.load %arg7[%c0_17, %c143] : memref<16x512xf32, #tpu.memory_space<vmem>>, vector<16x256xf32>
    %cst_18 = arith.constant 0.000000e+00 : f32
    %28 = vector.broadcast %cst_18 : f32 to vector<16x256xf32>
    %29 = arith.select %10, %27, %28 : vector<16x256xi1>, vector<16x256xf32>
    %c0_19 = arith.constant 0 : index
    %c144 = arith.constant 144 : index
    %30 = vector.load %arg7[%c0_19, %c144] : memref<16x512xf32, #tpu.memory_space<vmem>>, vector<16x256xf32>
    %c0_20 = arith.constant 0 : index
    %c145 = arith.constant 145 : index
    %31 = vector.load %arg7[%c0_20, %c145] : memref<16x512xf32, #tpu.memory_space<vmem>>, vector<16x256xf32>
    %cst_21 = arith.constant 0.000000e+00 : f32
    %32 = vector.broadcast %cst_21 : f32 to vector<16x256xf32>
    %33 = arith.select %12, %31, %32 : vector<16x256xi1>, vector<16x256xf32>
    %34 = tpu.concatenate %15, %16, %19, %22, %23, %26, %29, %30, %33 in 0 : vector<16x256xf32>, vector<16x256xf32>, vector<16x256xf32>, vector<16x256xf32>, vector<16x256xf32>, vector<16x256xf32>, vector<16x256xf32>, vector<16x256xf32>, vector<16x256xf32> -> vector<144x256xf32>
    %c0_22 = arith.constant 0 : index
    %c0_23 = arith.constant 0 : index
    %35 = vector.load %arg2[%c0_22, %c0_23] : memref<4x144xf32, #tpu.memory_space<vmem>>, vector<4x144xf32>
    %cst_24 = arith.constant dense<0.000000e+00> : vector<4x256xf32>
    %36 = tpu.matmul %35, %34, %cst_24 {dimension_numbers = #tpu.dot_dimension_numbers<[1], [0], [0], [1], [0, 0, 1, 1], [], []>} : vector<4x144xf32>, vector<144x256xf32>, vector<4x256xf32> -> vector<4x256xf32>
    %c0_25 = arith.constant 0 : index
    %c0_26 = arith.constant 0 : index
    %37 = vector.load %arg3[%c0_25, %c0_26] : memref<4x1xf32, #tpu.memory_space<vmem>>, vector<4x1xf32>
    %38 = vector.broadcast %37 : vector<4x1xf32> to vector<4x256xf32>
    %39 = arith.addf %36, %38 : vector<4x256xf32>
    %cst_27 = arith.constant 0.000000e+00 : f32
    %40 = vector.broadcast %cst_27 : f32 to vector<4x256xf32>
    %41 = arith.maximumf %39, %40 : vector<4x256xf32>
    %c0_28 = arith.constant 0 : index
    %c0_29 = arith.constant 0 : index
    %42 = vector.load %arg4[%c0_28, %c0_29] : memref<8x4xf32, #tpu.memory_space<vmem>>, vector<8x4xf32>
    %cst_30 = arith.constant dense<0.000000e+00> : vector<8x256xf32>
    %43 = tpu.matmul %42, %41, %cst_30 {dimension_numbers = #tpu.dot_dimension_numbers<[1], [0], [0], [1], [0, 0, 1, 1], [], []>} : vector<8x4xf32>, vector<4x256xf32>, vector<8x256xf32> -> vector<8x256xf32>
    %c0_31 = arith.constant 0 : index
    %c0_32 = arith.constant 0 : index
    %44 = vector.load %arg5[%c0_31, %c0_32] : memref<8x1xf32, #tpu.memory_space<vmem>>, vector<8x1xf32>
    %45 = vector.broadcast %44 : vector<8x1xf32> to vector<8x256xf32>
    %46 = arith.addf %43, %45 : vector<8x256xf32>
    %47 = vector.shape_cast %46 : vector<8x256xf32> to vector<1x8x256xf32>
    %c0_33 = arith.constant 0 : index
    %c0_34 = arith.constant 0 : index
    %c0_35 = arith.constant 0 : index
    %48 = vector.load %arg6[%c0_33, %c0_34, %c0_35] : memref<1x8x256xf32, #tpu.memory_space<vmem>>, vector<1x8x256xf32>
    tpu.vector_store %arg6[%c0_33, %c0_34, %c0_35], %47 {strides = array<i32>} : memref<1x8x256xf32, #tpu.memory_space<vmem>>, vector<1x8x256xf32>,
    return
  }
  func.func @transform_0(%arg0: i32) -> (i32, i32, i32) {
    %c0_i32 = arith.constant 0 : i32
    %c0_i32_0 = arith.constant 0 : i32
    %c0_i32_1 = arith.constant 0 : i32
    return %arg0, %c0_i32, %c0_i32_0 : i32, i32, i32
  }
  func.func @transform_1(%arg0: i32) -> (i32, i32) {
    %c0_i32 = arith.constant 0 : i32
    %c0_i32_0 = arith.constant 0 : i32
    %c0_i32_1 = arith.constant 0 : i32
    return %c0_i32, %c0_i32_0 : i32, i32
  }
  func.func @transform_2(%arg0: i32) -> (i32, i32) {
    %c0_i32 = arith.constant 0 : i32
    %c0_i32_0 = arith.constant 0 : i32
    %c0_i32_1 = arith.constant 0 : i32
    return %c0_i32, %c0_i32_0 : i32, i32
  }
  func.func @transform_3(%arg0: i32) -> (i32, i32) {
    %c0_i32 = arith.constant 0 : i32
    %c0_i32_0 = arith.constant 0 : i32
    %c0_i32_1 = arith.constant 0 : i32
    return %c0_i32, %c0_i32_0 : i32, i32
  }
  func.func @transform_4(%arg0: i32) -> (i32, i32) {
    %c0_i32 = arith.constant 0 : i32
    %c0_i32_0 = arith.constant 0 : i32
    %c0_i32_1 = arith.constant 0 : i32
    return %c0_i32, %c0_i32_0 : i32, i32
  }
  func.func @transform_5(%arg0: i32) -> (i32, i32, i32) {
    %c0_i32 = arith.constant 0 : i32
    %c0_i32_0 = arith.constant 0 : i32
    %c0_i32_1 = arith.constant 0 : i32
    return %arg0, %c0_i32, %c0_i32_0 : i32, i32, i32
  }
}

</mosaic_0001>

<bundles_post_ra>
// kernel: tpu_custom_call.1
= control target key start
LH: loop header
LB: loop body
LE: loop exit
PB: predicated region body
PF: predicated region fallthrough
CT: control target
= control target key end

     0   :  { %10 = vsyncpa [#allocation4], 0  ;;  %s1298_s0 = inlined_call_operand.hbm [shape: f32[2,16,256], index: 0, kind: input, shape index: {}]   ;;  %s1299_s1 = inlined_call_operand.vmem [shape: f32[4,144], index: 1, kind: input, shape index: {}]   ;;  %s1300_s2 = inlined_call_operand.vmem [shape: f32[4,1], index: 2, kind: input, shape index: {}]   ;;  %s1301_s3 = inlined_call_operand.vmem [shape: f32[8,4], index: 3, kind: input, shape index: {}]   ;;  %s1302_s4 = inlined_call_operand.vmem [shape: f32[8,1], index: 4, kind: input, shape index: {}]   ;;  %s1303_s5 = inlined_call_operand.hbm [shape: f32[2,8,256], index: 5, kind: output, shape index: {}]  }
   0x1   :  { %12 = vsyncpa [#allocation4 + $0x1], 0 }
   0x2   :  { %13 = vsyncpa [#allocation5], 0 }
   0x3   :  { %15 = vsyncpa [#allocation5 + $0x1], 0  ;;  %s1023_s18 = smov 0   ;;  %s1025_s19 = smov 0  }
   0x4   :  { %s1027_s20 = smov 0   ;;  %s1029_s21 = smov 0  }
   0x5 LB: > { %s1044_s22 = sadd.s32 4294967295, %s977_s21   ;;  %s740_s23 = sadd.s32 4294967294, %s977_s21   ;;  %s977_s21 = sphi %s1029_s21, %s1326_s21   ;;  %s973_s20 = sphi %s1027_s20, %s1325_s20   ;;  %s969_s19 = sphi %s1025_s19, %s1324_s19   ;;  %s965_s18 = sphi %s1023_s18, %s1323_s18  }
   0x6   : > { %s1048_s24 = sadd.s32 1, %s977_s21   ;;  %s28_s25 = sadd.s32 1, %s973_s20 }
   0x7   : > { %s25_s26 = ssub.s32 %s977_s21, %s1048_s24  ;;  %p35_p0 = scmp.ne.s32.totalorder %s973_s20, %s969_s19 }
   0x8   : > { %p26_p1 = scmp.eq.s32.totalorder %s25_s26, 0  ;;  %p36_p2 = scmp.eq.s32.totalorder %s977_s21, 0 }
   0x9   : > { %p41_p3 = scmp.ne.s32.totalorder %s969_s19, %s965_s18  ;;  %p42_p4 = scmp.eq.s32.totalorder %s1044_s22, 0 }
   0xa   : > { %s1060_s27 = scalar_select %p26_p1, %s973_s20, %s28_s25  }
   0xb   : > { %p1062_p5 = por %p36_p2, %p35_p0  ;;  %p1066_p6 = por %p42_p4, %p41_p3 }
   0xc   : > { %p149_p7 = scmp.eq.s32.totalorder %s1044_s22, 1  ;;  %p155_p8 = scmp.eq.s32.totalorder %s740_s23, 1 }
   0xd   : > { %s1307_s29 = scalar_select %p1066_p6, 1, 0 }
   0xe   : > { %p796_p10 = scmp.lt.s32.totalorder %s977_s21, 2  ;;  %p1073_p11 = por %p149_p7, %p35_p0 }
   0xf   : > { %p1077_p12 = por %p155_p8, %p41_p3  ;;  %s187_s7 = sand.u32 1, %s973_s20  }
  0x10   : > { %s1308_s30 = scalar_select %p1073_p11, 1, 0 }
  0x11   : > { %s1309_s6 = scalar_select %p1077_p12, 1, 0 }
  0x12   : > { %s782_s8 = sshll.u32 %s977_s21, 9  ;;  %s743_s9 = sshll.u32 %s187_s7, 5 }
  0x13   : > { %s1086_s12 = scalar_lea.hbm %s1298_s0, %s782_s8  ;;  %s191_s13 = scalar_lea.vmem [#allocation3], %s743_s9 }
  0x14   : > { %s198_s14 = sshll.u32 %s191_s13, 4  ;;  %p1090_p13 = pnand %p796_p10, %p1062_p5  ;;  %s1094_s14 = int_to_ptr.vmem [resolvable:$true] %s198_s14 }
  0x15   : > { %s1096_s16 = scalar_lea.sflag [#allocation4], %s187_s7  ;;  %s885_s17 = scalar_lea.hbm %s1086_s12, 512 }
  0x16   : > { %p886_p0 = scmp.ne.s32.totalorder %s1086_s12, %s885_s17  ;;  %p887_p1 = pneg %p1090_p13 }
  0x17   : > { %s890_s26 = scalar_lea.hbm %s1298_s0, 1024  ;;  %p891_p4 = scmp.lt.s32.totalorder %s1086_s12, %s1298_s0 }
  0x18   : > { %p888_p2 = pnand %p887_p1, %p886_p0  ;;  %p892_p5 = scmp.lt.s32.totalorder %s890_s26, %s885_s17 }
  0x1a   : > { %p889_p3 = pneg %p888_p2  ;;  %p893_p7 = por %p892_p5, %p891_p4 }
  0x1c   : > { %p894_p8 = pnand %p893_p7, %p889_p3 }
  0x1e   : > { %897 = shalt.err (!%p894_p8)
}
  0x1f   : > { %s898_s7 = scalar_lea.vmem %s1094_s14, 512  ;;  %s979_s9 = smov [#allocation3]  }
  0x20   : > { %p899_p10 = scmp.ne.s32.totalorder %s1094_s14, %s898_s7  ;;  %s903_s10 = sshll.u32 %s979_s9, 4  ;;  %s904_s10 = int_to_ptr.vmem [resolvable:$false] %s903_s10 }
  0x21   : > { %s905_s11 = scalar_lea.vmem %s904_s10, 1024  ;;  %p906_p2 = scmp.lt.s32.totalorder %s1094_s14, %s904_s10 }
  0x22   : > { %p901_p9 = pnand %p899_p10, %p887_p1  ;;  %p907_p12 = scmp.lt.s32.totalorder %s905_s11, %s898_s7 }
  0x24   : > { %p902_p0 = pneg %p901_p9  ;;  %p908_p11 = por %p907_p12, %p906_p2 }
  0x26   : > { %p909_p6 = pnand %p908_p11, %p902_p0 }
  0x28   : > { %912 = shalt.err (!%p909_p6)
}
  0x29   : > { %s980_s13 = smov 256   ;;  %s981_s17 = smov 16  }
  0x2a   : > { %791 = dma.hbm_to_vmem [thread:$0]  (!%p1090_p13), %s1086_s12, 512, %s1094_s14, %s1096_s16, %s980_s13, %s980_s13, %s981_s17  }
  0x2b   : > { %p746_p9 = scmp.ge.s32.totalorder %s977_s21, 1  ;;  %p206_p1 = scmp.lt.s32.totalorder %s977_s21, 3 }
  0x2d   : > { %p207_p3 = pnand %p746_p9, %p206_p1 }
  0x2e   : > { %s1120_s23 = sand.u32 (!%p207_p3), 1, %s969_s19   ;;  %p1311_p6 = scmp.ne.s32.totalorder (!%p207_p3), %s1307_s29, 0 }
  0x2f   : > { %210 = sbr.rel (%p207_p3) target bundleno = 659 (0x293), region = 40  ;;  %s747_s25 = sshll.u32 (!%p207_p3), %s1120_s23, 5 }
  0x30   : > { %s213_s26 = scalar_lea.sflag (!%p207_p3), [#allocation4], %s1120_s23  ;;  %s216_s28 = scalar_lea.vmem (!%p207_p3), [#allocation3], %s747_s25 }
  0x34   : > { %956 = dma.done.wait (%p1311_p6), %s213_s26, 512  }
  0x35   : > { %958 = vsyncadd (%p1311_p6), %s213_s26, 4294966784  ;;  %v982_v0 = vmov 0.0   ;;  %s983_s12 = smov 112   ;;  %v1128_v1 = vld [vmem:[%s216_s28 + $0x18] sm:$0xff]  ;;  %v1130_v2 = vld [vmem:[%s216_s28 + $0x10] sm:$0xff]  ;;  %s984_s29 = smov 113   ;;  %v255_v9 = vlaneseq }
  0x36   : > { %646 = vmatprep.mubr.f32.mxu1 %v982_v0  ;;  %843 = vrot.lane.b32.xlu0 %v982_v0, %s983_s12  ;;  %v1134_v3 = vld [vmem:[%s216_s28 + $0x8] sm:$0xff]  ;;  %v1136_v4 = vld [vmem:[%s216_s28] sm:$0xff]  ;;  %s985_s14 = smov 127   ;;  %s986_s15 = smov 1   ;;  %vm450_vm0 = vcmask 130048   ;;  %v990_v7 = vmov 0  }
  0x37   : > { %465 = vrot.lane.b32.xlu1 %v1130_v2, %s983_s12  ;;  %s987_s16 = smov 15   ;;  %s988_s8 = smov 16   ;;  %v1165_v5 = vld [vmem:[%s1299_s1] sm:$0xff]  ;;  %882 = vset.pattern.permute.xlu0 %v990_v7  ;;  %v256_v12 = vand.u32 127, %v255_v9  ;;  %vm471_vm1 = vcmask 916480   ;;  %vm400_vm2 = vcmask 924672  }
  0x38   : > { %s989_s7 = smov 17   ;;  %v488_v6 = vcombine.high %v1165_v5, %v1165_v5  ;;  %883 = vset.pattern.permute.xlu1 %v990_v7  ;;  %s991_s11 = smov 111   ;;  %v481_v8 = vld [vmem:[%s1300_s2] sm:$0xf]  ;;  %vm375_vm5 = vcmask 1039360   ;;  %vm338_vm8 = vcmask 7168  }
  0x39   : > { %v257_v17 = vadd.s32 128, %v256_v12  ;;  %v258_v24 = vand.u32 15, %v256_v12  ;;  %vm313_vm9 = vcmask 121856   ;;  %vm288_vm10 = vcmask 138240   ;;  %v564_v43 = vld [vmem:[%s1301_s3] sm:$0xff]  ;;  %s656_s10 = scalar_lea.sflag [#allocation5], %s1120_s23 }
  0x3a   : > { %467 = vrot.lane.b32.xlu0 %v1128_v1, %s983_s12  ;;  %773 = vmatprep.mubr.msk.f32.mxu0 %vm450_vm0, %v488_v6  ;;  %vm425_vm11 = vcmask 908288   ;;  %vm575_vm12 = vcmask 1043456   ;;  %vm571_vm13 = vcmask 31744   ;;  %p1320_p12 = scmp.ne.s32.totalorder %s1308_s30, 0  ;;  %s992_s13 = smov [#allocation6]  }
  0x3b   : > { %461 = vrot.lane.b32.xlu1 %v1134_v3, %s983_s12  ;;  %v259_v23 = vand.u32 15, %v257_v17  ;;  %vm1183_vm4 = vcmp.ge.s32.totalorder %v258_v24, 1  ;;  %vm1199_vm7 = vcmp.le.s32.totalorder %v258_v24, 14 }
  0x3d   : > { %vm1179_vm3 = vcmp.ge.s32.totalorder %v259_v23, 1  ;;  %vm1195_vm6 = vcmp.le.s32.totalorder %v259_v23, 14 }
  0x3e   : > { %459 = vrot.lane.b32.xlu0 %v1136_v4, %s983_s12 }
  0x3f   : > { %396 = vrot.lane.b32.xlu1 %v1128_v1, %s984_s29 }
  0x42   : > { %848 = vrot.lane.b32.xlu0 %v982_v0, %s984_s29 }
  0x43   : > { %394 = vrot.lane.b32.xlu1 %v1130_v2, %s984_s29 }
  0x46   : > { %390 = vrot.lane.b32.xlu0 %v1134_v3, %s984_s29 }
  0x47   : > { %388 = vrot.lane.b32.xlu1 %v1136_v4, %s984_s29  ;;  %s748_s29 = sshll.u32 %s1120_s23, 4 }
  0x4a   : > { %371 = vrot.lane.b32.xlu0 %v1128_v1, %s985_s14 }
  0x4b   : > { %853 = vrot.lane.b32.xlu1 %v982_v0, %s985_s14 }
  0x4e   : > { %369 = vrot.lane.b32.xlu0 %v1130_v2, %s985_s14 }
  0x4f   : > { %365 = vrot.lane.b32.xlu1 %v1134_v3, %s985_s14 }
  0x52   : > { %363 = vrot.lane.b32.xlu0 %v1136_v4, %s985_s14  ;;  %s783_s14 = sshll.u32 %s1044_s22, 8  ;;  %s917_s22 = sshll.u32 %s992_s13, 4  ;;  %s918_s22 = int_to_ptr.vmem [resolvable:$false] %s917_s22 }
  0x53   : > { %334 = vrot.lane.b32.xlu1 %v1130_v2, %s986_s15  ;;  %s668_s9 = scalar_lea.hbm %s1303_s5, %s783_s14  ;;  %s919_s17 = scalar_lea.vmem %s918_s22, 512 }
  0x56   : > { %336 = vrot.lane.b32.xlu0 %v1128_v1, %s986_s15 }
  0x57   : > { %858 = vrot.lane.b32.xlu1 %v982_v0, %s986_s15 }
  0x5a   : > { %328 = vrot.lane.b32.xlu0 %v1136_v4, %s986_s15 }
  0x5b   : > { %330 = vrot.lane.b32.xlu1 %v1134_v3, %s986_s15  ;;  %s242_s15 = scalar_lea.vmem [#allocation6], %s748_s29 }
  0x5e   : > { %309 = vrot.lane.b32.xlu0 %v1130_v2, %s987_s16 }
  0x5f   : > { %311 = vrot.lane.b32.xlu1 %v1128_v1, %s987_s16 }
  0x62   : > { %863 = vrot.lane.b32.xlu0 %v982_v0, %s987_s16 }
  0x63   : > { %303 = vrot.lane.b32.xlu1 %v1136_v4, %s987_s16 }
  0x66   : > { %305 = vrot.lane.b32.xlu0 %v1134_v3, %s987_s16  ;;  %s670_s16 = sshll.u32 %s242_s15, 4  ;;  %s671_s16 = int_to_ptr.vmem [resolvable:$true] %s670_s16 }
  0x67   : > { %446 = vrot.lane.b32.xlu1 %v1130_v2, %s988_s8  ;;  %p920_p5 = scmp.lt.s32.totalorder %s671_s16, %s918_s22 }
  0x6a   : > { %448 = vrot.lane.b32.xlu0 %v1128_v1, %s988_s8 }
  0x6b   : > { %868 = vrot.lane.b32.xlu1 %v982_v0, %s988_s8 }
  0x6e   : > { %440 = vrot.lane.b32.xlu0 %v1136_v4, %s988_s8 }
  0x6f   : > { %442 = vrot.lane.b32.xlu1 %v1134_v3, %s988_s8 }
  0x72   : > { %284 = vrot.lane.b32.xlu0 %v1130_v2, %s989_s7 }
  0x73   : > { %286 = vrot.lane.b32.xlu1 %v1128_v1, %s989_s7 }
  0x76   : > { %873 = vrot.lane.b32.xlu0 %v982_v0, %s989_s7 }
  0x77   : > { %278 = vrot.lane.b32.xlu1 %v1136_v4, %s989_s7 }
  0x7a   : > { %280 = vrot.lane.b32.xlu0 %v1134_v3, %s989_s7 }
  0x7b   : > { %421 = vrot.lane.b32.xlu1 %v1128_v1, %s991_s11 }
  0x7e   : > { %878 = vrot.lane.b32.xlu0 %v982_v0, %s991_s11 }
  0x7f   : > { %419 = vrot.lane.b32.xlu1 %v1130_v2, %s991_s11 }
  0x82   : > { %415 = vrot.lane.b32.xlu0 %v1134_v3, %s991_s11 }
  0x83   : > { %413 = vrot.lane.b32.xlu1 %v1136_v4, %s991_s11  ;;  %s913_s11 = scalar_lea.vmem %s671_s16, 256 }
  0x84   : > { %p914_p11 = scmp.ne.s32.totalorder %s671_s16, %s913_s11  ;;  %p921_p7 = scmp.lt.s32.totalorder %s919_s17, %s913_s11 }
  0x86   : > { %484 = vperm.xlu0 %882, %v481_v8   ;;  %p915_p13 = pnand %p914_p11, %p1320_p12  ;;  %p922_p8 = por %p921_p7, %p920_p5 }
  0x88   : > { %p916_p4 = pneg %p915_p13 }
  0x8a   : > { %p923_p10 = pnand %p922_p8, %p916_p4 }
  0xa8   : > { %v844_v10 = vpop.permute.xlu0 %843 }
  0xa9   : > { %v845_v11 = vunpack.i.l.bf16 %v844_v10  ;;  %v466_v14 = vpop.permute.xlu1 %465  ;;  %v846_v18 = vunpack.i.h.bf16 %v844_v10 }
  0xac   : > { %v468_v13 = vpop.permute.xlu0 %467 }
  0xad   : > { %v475_v15 = vsel %vm471_vm1, %v468_v13, %v845_v11  ;;  %v474_v16 = vsel %vm471_vm1, %v466_v14, %v468_v13  ;;  %v462_v19 = vpop.permute.xlu1 %461 }
  0xae   : > { %491 = vmatprep.subr.mxu0 %v475_v15  ;;  %v473_v21 = vsel %vm471_vm1, %v462_v19, %v846_v18 }
  0xaf   : > { %492 = vmatpush1.msra.mxu0 %v474_v16 }
  0xb0   : > { %v460_v20 = vpop.permute.xlu0 %459  ;;  %493 = vmatprep.subr.mxu0 %v473_v21 }
  0xb1   : > { %v472_v22 = vsel %vm471_vm1, %v460_v20, %v462_v19  ;;  %v397_v25 = vpop.permute.xlu1 %396 }
  0xb2   : > { %494 = vmatpush1.msra.mxu0 %v472_v22 }
  0xb4   : > { %v849_v26 = vpop.permute.xlu0 %848 }
  0xb5   : > { %v851_v27 = vunpack.i.h.bf16 %v849_v26  ;;  %v850_v28 = vunpack.i.l.bf16 %v849_v26  ;;  %v395_v32 = vpop.permute.xlu1 %394 }
  0xb6   : > { %v403_v34 = vsel %vm400_vm2, %v395_v32, %v397_v25 }
  0xb7   : > { %v404_v30 = vsel %vm400_vm2, %v397_v25, %v850_v28 }
  0xb8   : > { %v391_v33 = vpop.permute.xlu0 %390  ;;  %749 = vmatprep.subr.msk.mxu0 %vm1179_vm3, %v404_v30 }
  0xb9   : > { %v402_v35 = vsel %vm400_vm2, %v391_v33, %v851_v27  ;;  %750 = vmatpush1.msk.msra.mxu0 %vm1183_vm4, %v403_v34  ;;  %v389_v36 = vpop.permute.xlu1 %388 }
  0xba   : > { %751 = vmatprep.subr.msk.mxu0 %vm1179_vm3, %v402_v35  ;;  %v401_v38 = vsel %vm400_vm2, %v389_v36, %v391_v33 }
  0xbb   : > { %752 = vmatpush1.msk.msra.mxu0 %vm1183_vm4, %v401_v38 }
  0xbc   : > { %v372_v37 = vpop.permute.xlu0 %371 }
  0xbd   : > { %v854_v39 = vpop.permute.xlu1 %853 }
  0xbe   : > { %v855_v41 = vunpack.i.l.bf16 %v854_v39  ;;  %v856_v44 = vunpack.i.h.bf16 %v854_v39 }
  0xc0   : > { %v370_v40 = vpop.permute.xlu0 %369  ;;  %v379_v45 = vsel %vm375_vm5, %v372_v37, %v855_v41 }
  0xc1   : > { %v378_v46 = vsel %vm375_vm5, %v370_v40, %v372_v37  ;;  %v366_v47 = vpop.permute.xlu1 %365  ;;  %753 = vmatprep.subr.msk.mxu0 %vm1195_vm6, %v379_v45  ;;  %v565_v45 = vld [vmem:[%s1302_s4] sm:$0xff] }
  0xc2   : > { %v377_v49 = vsel %vm375_vm5, %v366_v47, %v856_v44  ;;  %754 = vmatpush1.msk.msra.mxu0 %vm1199_vm7, %v378_v46  ;;  %568 = vperm.xlu1 %883, %v565_v45  }
  0xc3   : > { %755 = vmatprep.subr.msk.mxu0 %vm1195_vm6, %v377_v49 }
  0xc4   : > { %v364_v48 = vpop.permute.xlu0 %363 }
  0xc5   : > { %v376_v50 = vsel %vm375_vm5, %v364_v48, %v366_v47  ;;  %v335_v51 = vpop.permute.xlu1 %334 }
  0xc6   : > { %756 = vmatpush1.msk.msra.mxu0 %vm1199_vm7, %v376_v50 }
  0xc7   : > { %503 = vmatprep.subr.mxu0 %v1128_v1 }
  0xc8   : > { %v337_v52 = vpop.permute.xlu0 %336  ;;  %504 = vmatpush1.msra.mxu0 %v1130_v2 }
  0xc9   : > { %505 = vmatprep.subr.mxu0 %v1134_v3  ;;  %v342_v53 = vsel %vm338_vm8, %v335_v51, %v337_v52  ;;  %v859_v54 = vpop.permute.xlu1 %858 }
  0xca   : > { %506 = vmatpush1.msra.mxu0 %v1136_v4  ;;  %v860_v56 = vunpack.i.l.bf16 %v859_v54  ;;  %v861_v57 = vunpack.i.h.bf16 %v859_v54 }
  0xcb   : > { %757 = vmatprep.subr.msk.mxu0 %vm1179_vm3, %v342_v53 }
  0xcc   : > { %v329_v55 = vpop.permute.xlu0 %328  ;;  %v341_v58 = vsel %vm338_vm8, %v860_v56, %v335_v51 }
  0xcd   : > { %v331_v59 = vpop.permute.xlu1 %330  ;;  %758 = vmatpush1.msk.msra.mxu0 %vm1183_vm4, %v341_v58  ;;  %v339_v62 = vsel %vm338_vm8, %v861_v57, %v329_v55 }
  0xce   : > { %v340_v61 = vsel %vm338_vm8, %v329_v55, %v331_v59 }
  0xcf   : > { %759 = vmatprep.subr.msk.mxu0 %vm1179_vm3, %v340_v61 }
  0xd0   : > { %v310_v60 = vpop.permute.xlu0 %309  ;;  %760 = vmatpush1.msk.msra.mxu0 %vm1183_vm4, %v339_v62 }
  0xd1   : > { %v312_v63 = vpop.permute.xlu1 %311 }
  0xd2   : > { %v317_v1 = vsel %vm313_vm9, %v310_v60, %v312_v63 }
  0xd3   : > { %761 = vmatprep.subr.msk.mxu0 %vm1195_vm6, %v317_v1 }
  0xd4   : > { %v864_v0 = vpop.permute.xlu0 %863 }
  0xd5   : > { %v866_v2 = vunpack.i.h.bf16 %v864_v0  ;;  %v865_v3 = vunpack.i.l.bf16 %v864_v0  ;;  %v304_v6 = vpop.permute.xlu1 %303 }
  0xd7   : > { %v316_v4 = vsel %vm313_vm9, %v865_v3, %v310_v60  ;;  %v314_v8 = vsel %vm313_vm9, %v866_v2, %v304_v6 }
  0xd8   : > { %v306_v7 = vpop.permute.xlu0 %305  ;;  %762 = vmatpush1.msk.msra.mxu0 %vm1199_vm7, %v316_v4 }
  0xd9   : > { %v315_v9 = vsel %vm313_vm9, %v304_v6, %v306_v7  ;;  %v447_v10 = vpop.permute.xlu1 %446 }
  0xda   : > { %763 = vmatprep.subr.msk.mxu0 %vm1195_vm6, %v315_v9 }
  0xdb   : > { %764 = vmatpush1.msk.msra.mxu0 %vm1199_vm7, %v314_v8 }
  0xdc   : > { %v449_v11 = vpop.permute.xlu0 %448 }
  0xdd   : > { %v454_v12 = vsel %vm450_vm0, %v447_v10, %v449_v11  ;;  %v869_v13 = vpop.permute.xlu1 %868 }
  0xde   : > { %515 = vmatprep.subr.mxu0 %v454_v12  ;;  %v870_v15 = vunpack.i.l.bf16 %v869_v13  ;;  %v871_v16 = vunpack.i.h.bf16 %v869_v13 }
  0xe0   : > { %v441_v14 = vpop.permute.xlu0 %440  ;;  %v453_v17 = vsel %vm450_vm0, %v870_v15, %v447_v10 }
  0xe1   : > { %v443_v18 = vpop.permute.xlu1 %442  ;;  %516 = vmatpush1.msra.mxu0 %v453_v17  ;;  %v451_v21 = vsel %vm450_vm0, %v871_v16, %v441_v14 }
  0xe2   : > { %v452_v20 = vsel %vm450_vm0, %v441_v14, %v443_v18 }
  0xe3   : > { %517 = vmatprep.subr.mxu0 %v452_v20 }
  0xe4   : > { %v285_v19 = vpop.permute.xlu0 %284  ;;  %518 = vmatpush1.msra.mxu0 %v451_v21 }
  0xe5   : > { %v287_v22 = vpop.permute.xlu1 %286 }
  0xe6   : > { %v292_v24 = vsel %vm288_vm10, %v285_v19, %v287_v22 }
  0xe7   : > { %765 = vmatprep.subr.msk.mxu0 %vm1179_vm3, %v292_v24 }
  0xe8   : > { %v874_v23 = vpop.permute.xlu0 %873 }
  0xe9   : > { %v876_v25 = vunpack.i.h.bf16 %v874_v23  ;;  %v875_v26 = vunpack.i.l.bf16 %v874_v23  ;;  %v279_v28 = vpop.permute.xlu1 %278 }
  0xeb   : > { %v291_v27 = vsel %vm288_vm10, %v875_v26, %v285_v19  ;;  %v289_v32 = vsel %vm288_vm10, %v876_v25, %v279_v28 }
  0xec   : > { %v281_v30 = vpop.permute.xlu0 %280  ;;  %766 = vmatpush1.msk.msra.mxu0 %vm1183_vm4, %v291_v27 }
  0xed   : > { %v290_v33 = vsel %vm288_vm10, %v279_v28, %v281_v30  ;;  %v422_v34 = vpop.permute.xlu1 %421 }
  0xee   : > { %767 = vmatprep.subr.msk.mxu0 %vm1179_vm3, %v290_v33 }
  0xef   : > { %768 = vmatpush1.msk.msra.mxu0 %vm1183_vm4, %v289_v32 }
  0xf0   : > { %v879_v35 = vpop.permute.xlu0 %878 }
  0xf1   : > { %v881_v36 = vunpack.i.h.bf16 %v879_v35  ;;  %v880_v37 = vunpack.i.l.bf16 %v879_v35  ;;  %v420_v39 = vpop.permute.xlu1 %419 }
  0xf2   : > { %v428_v41 = vsel %vm425_vm11, %v420_v39, %v422_v34 }
  0xf3   : > { %v429_v38 = vsel %vm425_vm11, %v422_v34, %v880_v37 }
  0xf4   : > { %769 = vmatprep.subr.msk.mxu0 %vm1195_vm6, %v429_v38  ;;  %v416_v40 = vpop.permute.xlu0 %415 }
  0xf5   : > { %v427_v44 = vsel %vm425_vm11, %v416_v40, %v881_v36  ;;  %770 = vmatpush2.msk.msra.mxu0 %vm1199_vm7, %v428_v41  ;;  %v414_v29 = vpop.permute.xlu1 %413 }
  0xf6   : > { %771 = vmatprep.subr.msk.mxu0 %vm1195_vm6, %v427_v44  ;;  %v426_v31 = vsel %vm425_vm11, %v414_v29, %v416_v40 }
  0xf7   : > { %772 = vmatpush2.msk.msra.mxu0 %vm1199_vm7, %v426_v31 }
  0xf8   : > { %556 = vmatmul.mubr.f32.vlgmr.msra.gmra.mxu0 %v1165_v5 }
 0x101   : > { %v485_v46 = vpop.permute.xlu0 %484 }
 0x13d   : > { %v569_v5 = vpop.permute.xlu1 %568 }
 0x1b8   : > { %v557_v47 = vpop.f32.mrf.mxu0 }
 0x1b9   : > { %v558_v48 = vadd.f32 %v557_v47, %v485_v46 }
 0x1ba   : > { %v559_v49 = vpop.f32.mrf.mxu0 }
 0x1bb   : > { %v560_v42 = vadd.f32 %v559_v49, %v485_v46  ;;  %v562_v51 = vmax.f32 %v558_v48, 0.0 }
 0x1bd   : > { %v563_v50 = vmax.f32 %v560_v42, 0.0 }
 0x1bf   : > { %774 = vmatprep.subr.msk.mxu1 %vm575_vm12, %v563_v50 }
 0x1c0   : > { %775 = vmatpush1.msk.msra.mxu1 %vm575_vm12, %v562_v51 }
 0x1c1   : > { %776 = vmatmul.mubr.msk.f32.vlgmr.msra.gmra.mxu1 %vm571_vm13, %v564_v43 }
 0x281   : > { %v648_v52 = vpop.f32.mrf.mxu1 }
 0x282   : > { %v649_v53 = vadd.f32 %v648_v52, %v569_v5 }
 0x283   : > { %v650_v54 = vpop.f32.mrf.mxu1 }
 0x284   : > { %653 = vst [vmem:[%s242_s15] sm:$0xff] %v649_v53  ;;  %v651_v55 = vadd.f32 %v650_v54, %v569_v5 }
 0x286   : > { %654 = vst [vmem:[%s242_s15 + $0x8] sm:$0xff] %v651_v55 }
 0x287   : > { %926 = shalt.err (!%p923_p10)
}
 0x288   : > { %s927_s25 = scalar_lea.hbm %s668_s9, 256  ;;  %s931_s28 = scalar_lea.hbm %s1303_s5, 512 }
 0x289   : > { %p928_p0 = scmp.ne.s32.totalorder %s668_s9, %s927_s25  ;;  %p932_p1 = scmp.lt.s32.totalorder %s668_s9, %s1303_s5 }
 0x28a   : > { %p933_p3 = scmp.lt.s32.totalorder %s931_s28, %s927_s25 }
 0x28b   : > { %p929_p2 = pnand %p928_p0, %p1320_p12 }
 0x28c   : > { %p934_p6 = por %p933_p3, %p932_p1 }
 0x28d   : > { %p930_p9 = pneg %p929_p2 }
 0x28f   : > { %p935_p11 = pnand %p934_p6, %p930_p9 }
 0x291   : > { %938 = shalt.err (!%p935_p11)
}
 0x292   : > { %786 = dma.vmem_to_hbm [thread:$0]  (%p1320_p12), %s671_s16, 256, %s668_s9, %s656_s10  }
 0x293 PF: > { %s682_s14 = sand.u32 1, %s965_s18   ;;  %p1321_p13 = scmp.ne.s32.totalorder %s1309_s6, 0 }
 0x294   : > { %p1322_p4 = scmp.ge.s32.totalorder %s977_s21, 2  ;;  %s683_s15 = scalar_lea.sflag [#allocation5], %s682_s14 }
 0x296   : > { %p793_p5 = pnand %p1322_p4, %p1321_p13 }
 0x298   : > { %p794_p7 = pneg %p793_p5 }
 0x29a   : > { %960 = dma.done.wait (%p794_p7), %s683_s15, 256  }
 0x29b   : > { %962 = vsyncadd (%p794_p7), %s683_s15, 4294967040  ;;  %p18_p8 = scmp.ge.s32.totalorder %s1048_s24, 4   ;;  %s1323_s18 = smov %s969_s19 }
 0x29c   : > { %s1324_s19 = smov %s973_s20  ;;  %s1325_s20 = smov %s1060_s27 }
 0x29d   : > { %s1326_s21 = smov %s1048_s24  ;;  %20 = sbr.rel (!%p18_p8) target bundleno = 5 (0x5), region = 85 }
 0x2a2   :  { %688 = vsyncpa [#allocation4], 1 }
 0x2a3   :  { %690 = vsyncpa [#allocation4 + $0x1], 1 }
 0x2a4   :  { %691 = vsyncpa [#allocation5], 1 }
 0x2a5   :  { %693 = vsyncpa [#allocation5 + $0x1], 1 }

</bundles_post_ra>
